<compile_context>
chip_gen: v5e
topology: v5e:2x2
jax: 0.10.0
libtpu: 0.0.40
codegen_flags: <defaults>
</compile_context>

<pallas_src>
import functools

import jax
import jax.numpy as jnp
from jax.experimental import pallas as pl
from jax.experimental.pallas import tpu as pltpu

ALPHA = 2
BETA = 4
LANES = 128
MAX_TILE_R = 1024  # 1024 x 128 f32 = 512 KiB per input block


def _neg_loss_kernel(*refs, tile_r, n_valid, needs_tail_mask, has_mask):
    """Per-block partial sums: out block (1, 3, 8, 128) = [pos_loss, neg_loss, pos_inds]."""
    if has_mask:
        pred_ref, gt_ref, mask_ref, out_ref = refs
    else:
        pred_ref, gt_ref, out_ref = refs
        mask_ref = None

    pred = pred_ref[...].astype(jnp.float32)
    gt = gt_ref[...].astype(jnp.float32)
    m = mask_ref[...].astype(jnp.float32) if has_mask else None

    if needs_tail_mask:
        # Last block (and/or lane padding) contains invalid elements: build a
        # validity mask from the global flat element index and sanitize inputs
        # so garbage can never produce NaN/Inf.
        i = pl.program_id(0)
        rows = jax.lax.broadcasted_iota(jnp.int32, (tile_r, LANES), 0)
        lanes = jax.lax.broadcasted_iota(jnp.int32, (tile_r, LANES), 1)
        gidx = (i * tile_r + rows) * LANES + lanes
        valid = gidx < n_valid
        pred = jnp.where(valid, pred, 0.0)
        gt = jnp.where(valid, gt, 0.0)
        vf = valid.astype(jnp.float32)
        m = vf if m is None else m * vf

    # pred.sigmoid_() followed by clamp, exactly as in the PyTorch module.
    p = jax.nn.sigmoid(pred)
    p = jnp.clip(p, 0.0001, 1.0 - 0.0001)

    pos_inds = (gt == 1.0).astype(jnp.float32)
    neg_inds = (gt < 1.0).astype(jnp.float32)
    if m is not None:
        pos_inds = pos_inds * m
        neg_inds = neg_inds * m

    # Integer powers as explicit VPU multiplies (beta=4, alpha=2).
    one_m_gt = 1.0 - gt
    t2 = one_m_gt * one_m_gt
    neg_weights = t2 * t2  # (1 - gt) ** 4

    one_m_p = 1.0 - p
    pos_loss = jnp.log(p) * (one_m_p * one_m_p) * pos_inds
    neg_loss = jnp.log(one_m_p) * (p * p) * neg_weights * neg_inds

    def rsum(x):
        # (tile_r, 128) -> (8, 128): reduce only the leading axis (pure VPU adds,
        # (8,128) vreg layout preserved).  Cross-lane reduction deferred to the wrapper.
        return jnp.sum(x.reshape(tile_r // 8, 8, LANES), axis=0)

    out_ref[0, 0] = rsum(pos_loss)
    out_ref[0, 1] = rsum(neg_loss)
    out_ref[0, 2] = rsum(pos_inds)


@jax.jit
def neg_loss(pred, gt, mask=None):
    """Modified focal loss, identical semantics to the PyTorch Neg_loss.forward."""
    n = pred.size
    rows = pl.cdiv(n, LANES)
    rows_p = ((rows + 7) // 8) * 8            # sublane-aligned row count
    tile_r = min(MAX_TILE_R, rows_p)          # block never exceeds the array
    num_blocks = pl.cdiv(rows_p, tile_r)
    needs_tail_mask = (n % (tile_r * LANES)) != 0
    has_mask = mask is not None

    def to_lanes(x):
        x = jnp.ravel(x)
        pad = rows_p * LANES - n
        if pad:                                # rare: only when n % 1024 != 0
            x = jnp.pad(x, (0, pad))
        return x.reshape(rows_p, LANES)

    inputs = [to_lanes(pred), to_lanes(gt)]
    if has_mask:
        inputs.append(to_lanes(jnp.broadcast_to(mask, pred.shape)))

    in_spec = pl.BlockSpec((tile_r, LANES), lambda i: (i, 0))

    kernel = functools.partial(
        _neg_loss_kernel,
        tile_r=tile_r,
        n_valid=n,
        needs_tail_mask=needs_tail_mask,
        has_mask=has_mask,
    )

    partials = pl.pallas_call(
        kernel,
        out_shape=jax.ShapeDtypeStruct((num_blocks, 3, 8, LANES), jnp.float32),
        grid_spec=pltpu.PrefetchScalarGridSpec(
            num_scalar_prefetch=0,
            grid=(num_blocks,),
            in_specs=[in_spec] * len(inputs),
            out_specs=pl.BlockSpec((1, 3, 8, LANES), lambda i: (i, 0, 0, 0)),
        ),
        compiler_params=pltpu.CompilerParams(
            dimension_semantics=("parallel",),
        ),
    )(*inputs)

    sums = jnp.sum(partials, axis=(0, 2, 3))  # tiny final reduction in XLA
    pos_loss_sum, neg_loss_sum, num_pos = sums[0], sums[1], sums[2]
    safe_num_pos = jnp.where(num_pos == 0.0, 1.0, num_pos)
    return jnp.where(
        num_pos == 0.0,
        -neg_loss_sum,
        -(pos_loss_sum + neg_loss_sum) / safe_num_pos,
    )


def _neg_loss_ref(pred, gt, mask=None):
    """Pure-JAX reference mirroring the PyTorch forward, for verification."""
    p = jnp.clip(jax.nn.sigmoid(pred.astype(jnp.float32)), 0.0001, 1.0 - 0.0001)
    gt = gt.astype(jnp.float32)
    pos_inds = (gt == 1.0).astype(jnp.float32)
    neg_inds = (gt < 1.0).astype(jnp.float32)
    if mask is not None:
        pos_inds = pos_inds * mask
        neg_inds = neg_inds * mask
    neg_weights = (1.0 - gt) ** BETA
    pos_loss = jnp.sum(jnp.log(p) * (1.0 - p) ** ALPHA * pos_inds)
    neg_loss = jnp.sum(jnp.log(1.0 - p) * p ** ALPHA * neg_weights * neg_inds)
    num_pos = jnp.sum(pos_inds)
    return jnp.where(num_pos == 0.0, -neg_loss,
                     -(pos_loss + neg_loss) / jnp.where(num_pos == 0.0, 1.0, num_pos))


if __name__ == "__main__":
    key = jax.random.PRNGKey(0)
    k1, k2, k3, k4, k5 = jax.random.split(key, 5)

    B, C, H, W = 2, 4, 16, 16
    pred = jax.random.normal(k1, (B, C, H, W), jnp.float32)

    # Heatmap-style ground truth in [0, 1) with a few exact-1.0 "center" pixels.
    gt = jax.random.uniform(k2, (B, C, H, W), jnp.float32, minval=0.0, maxval=0.95)
    peaks = jax.random.bernoulli(k3, 0.02, (B, C, H, W))
    gt = jnp.where(peaks, 1.0, gt)

    loss = jax.block_until_ready(neg_loss(pred, gt))
    ref = _neg_loss_ref(pred, gt)
    assert jnp.allclose(loss, ref, rtol=1e-4, atol=1e-5), (loss, ref)

    # Mask path (random binary mask).
    mask = jax.random.bernoulli(k4, 0.7, (B, C, H, W)).astype(jnp.float32)
    loss_m = jax.block_until_ready(neg_loss(pred, gt, mask))
    ref_m = _neg_loss_ref(pred, gt, mask)
    assert jnp.allclose(loss_m, ref_m, rtol=1e-4, atol=1e-5), (loss_m, ref_m)

    # num_pos == 0 branch.
    gt_nopos = jnp.clip(gt, 0.0, 0.9)
    loss_np = jax.block_until_ready(neg_loss(pred, gt_nopos))
    ref_np = _neg_loss_ref(pred, gt_nopos)
    assert jnp.allclose(loss_np, ref_np, rtol=1e-4, atol=1e-5), (loss_np, ref_np)

    # Ragged shape (exercises the minimal lane pad + in-kernel tail mask).
    pred_o = jax.random.normal(k5, (2, 3, 5, 7), jnp.float32)
    gt_o = jnp.where(jax.random.bernoulli(k3, 0.05, (2, 3, 5, 7)), 1.0,
                     jax.random.uniform(k2, (2, 3, 5, 7), jnp.float32, maxval=0.95))
    loss_o = jax.block_until_ready(neg_loss(pred_o, gt_o))
    ref_o = _neg_loss_ref(pred_o, gt_o)
    assert jnp.allclose(loss_o, ref_o, rtol=1e-4, atol=1e-5), (loss_o, ref_o)

    print("KERNEL_OK")
</pallas_src>

<mosaic_0001>
module attributes {stable_mosaic.version = 11 : i64} {
  func.func @_neg_loss_kernel(%arg0: i32, %arg1: memref<16x128xf32, #tpu.memory_space<vmem>>, %arg2: memref<16x128xf32, #tpu.memory_space<vmem>>, %arg3: memref<1x3x8x128xf32, #tpu.memory_space<vmem>>) attributes {dimension_semantics = [#tpu.dimension_semantics<parallel>], iteration_bounds = array<i64: 1>, scalar_prefetch = 0 : i64, scratch_operands = 0 : i64, tpu.core_type = #tpu.core_type<tc>, window_params = [{transform_indices = @transform_0, window_bounds = array<i64: 16, 128>}, {transform_indices = @transform_1, window_bounds = array<i64: 16, 128>}, {transform_indices = @transform_2, window_bounds = array<i64: 1, 3, 8, 128>}]} {
    %c0 = arith.constant 0 : index
    %c0_0 = arith.constant 0 : index
    %0 = vector.load %arg1[%c0, %c0_0] : memref<16x128xf32, #tpu.memory_space<vmem>>, vector<16x128xf32>
    %c0_1 = arith.constant 0 : index
    %c0_2 = arith.constant 0 : index
    %1 = vector.load %arg2[%c0_1, %c0_2] : memref<16x128xf32, #tpu.memory_space<vmem>>, vector<16x128xf32>
    %2 = arith.negf %0 : vector<16x128xf32>
    %3 = math.exp %2 : vector<16x128xf32>
    %cst = arith.constant 1.000000e+00 : f32
    %4 = vector.broadcast %cst : f32 to vector<16x128xf32>
    %5 = arith.addf %4, %3 : vector<16x128xf32>
    %6 = arith.divf %4, %5 : vector<16x128xf32>
    %cst_3 = arith.constant 9.99999974E-5 : f32
    %cst_4 = arith.constant 0.999899983 : f32
    %7 = vector.broadcast %cst_3 : f32 to vector<16x128xf32>
    %8 = arith.maximumf %7, %6 : vector<16x128xf32>
    %9 = vector.broadcast %cst_4 : f32 to vector<16x128xf32>
    %10 = arith.minimumf %9, %8 : vector<16x128xf32>
    %cst_5 = arith.constant 1.000000e+00 : f32
    %11 = vector.broadcast %cst_5 : f32 to vector<16x128xf32>
    %12 = arith.cmpf oeq, %1, %11 : vector<16x128xf32>
    %13 = arith.extui %12 : vector<16x128xi1> to vector<16x128xi32>
    %14 = arith.sitofp %13 : vector<16x128xi32> to vector<16x128xf32>
    %cst_6 = arith.constant 1.000000e+00 : f32
    %15 = vector.broadcast %cst_6 : f32 to vector<16x128xf32>
    %16 = arith.cmpf olt, %1, %15 : vector<16x128xf32>
    %17 = arith.extui %16 : vector<16x128xi1> to vector<16x128xi32>
    %18 = arith.sitofp %17 : vector<16x128xi32> to vector<16x128xf32>
    %cst_7 = arith.constant 1.000000e+00 : f32
    %19 = vector.broadcast %cst_7 : f32 to vector<16x128xf32>
    %20 = arith.subf %19, %1 : vector<16x128xf32>
    %21 = arith.mulf %20, %20 : vector<16x128xf32>
    %22 = arith.mulf %21, %21 : vector<16x128xf32>
    %cst_8 = arith.constant 1.000000e+00 : f32
    %23 = vector.broadcast %cst_8 : f32 to vector<16x128xf32>
    %24 = arith.subf %23, %10 : vector<16x128xf32>
    %25 = math.log %10 : vector<16x128xf32>
    %26 = arith.mulf %24, %24 : vector<16x128xf32>
    %27 = arith.mulf %25, %26 : vector<16x128xf32>
    %28 = arith.mulf %27, %14 : vector<16x128xf32>
    %29 = math.log %24 : vector<16x128xf32>
    %30 = arith.mulf %10, %10 : vector<16x128xf32>
    %31 = arith.mulf %29, %30 : vector<16x128xf32>
    %32 = arith.mulf %31, %22 : vector<16x128xf32>
    %33 = arith.mulf %32, %18 : vector<16x128xf32>
    %34 = vector.shape_cast %28 : vector<16x128xf32> to vector<2x8x128xf32>
    %cst_9 = arith.constant dense<0.000000e+00> : vector<8x128xf32>
    %35 = vector.multi_reduction <add>, %34, %cst_9 [0] : vector<2x8x128xf32> to vector<8x128xf32>
    %c0_10 = arith.constant 0 : index
    %c0_11 = arith.constant 0 : index
    %c0_12 = arith.constant 0 : index
    %c0_13 = arith.constant 0 : index
    %36 = vector.load %arg3[%c0_10, %c0_11, %c0_12, %c0_13] : memref<1x3x8x128xf32, #tpu.memory_space<vmem>>, vector<1x1x8x128xf32>
    %37 = vector.shape_cast %36 : vector<1x1x8x128xf32> to vector<8x128xf32>
    %38 = vector.shape_cast %35 : vector<8x128xf32> to vector<1x1x8x128xf32>
    tpu.vector_store %arg3[%c0_10, %c0_11, %c0_12, %c0_13], %38 {strides = array<i32>} : memref<1x3x8x128xf32, #tpu.memory_space<vmem>>, vector<1x1x8x128xf32>,
    %39 = vector.shape_cast %33 : vector<16x128xf32> to vector<2x8x128xf32>
    %cst_14 = arith.constant dense<0.000000e+00> : vector<8x128xf32>
    %40 = vector.multi_reduction <add>, %39, %cst_14 [0] : vector<2x8x128xf32> to vector<8x128xf32>
    %c0_15 = arith.constant 0 : index
    %c1 = arith.constant 1 : index
    %c0_16 = arith.constant 0 : index
    %c0_17 = arith.constant 0 : index
    %41 = vector.load %arg3[%c0_15, %c1, %c0_16, %c0_17] : memref<1x3x8x128xf32, #tpu.memory_space<vmem>>, vector<1x1x8x128xf32>
    %42 = vector.shape_cast %41 : vector<1x1x8x128xf32> to vector<8x128xf32>
    %43 = vector.shape_cast %40 : vector<8x128xf32> to vector<1x1x8x128xf32>
    tpu.vector_store %arg3[%c0_15, %c1, %c0_16, %c0_17], %43 {strides = array<i32>} : memref<1x3x8x128xf32, #tpu.memory_space<vmem>>, vector<1x1x8x128xf32>,
    %44 = vector.shape_cast %14 : vector<16x128xf32> to vector<2x8x128xf32>
    %cst_18 = arith.constant dense<0.000000e+00> : vector<8x128xf32>
    %45 = vector.multi_reduction <add>, %44, %cst_18 [0] : vector<2x8x128xf32> to vector<8x128xf32>
    %c0_19 = arith.constant 0 : index
    %c2 = arith.constant 2 : index
    %c0_20 = arith.constant 0 : index
    %c0_21 = arith.constant 0 : index
    %46 = vector.load %arg3[%c0_19, %c2, %c0_20, %c0_21] : memref<1x3x8x128xf32, #tpu.memory_space<vmem>>, vector<1x1x8x128xf32>
    %47 = vector.shape_cast %46 : vector<1x1x8x128xf32> to vector<8x128xf32>
    %48 = vector.shape_cast %45 : vector<8x128xf32> to vector<1x1x8x128xf32>
    tpu.vector_store %arg3[%c0_19, %c2, %c0_20, %c0_21], %48 {strides = array<i32>} : memref<1x3x8x128xf32, #tpu.memory_space<vmem>>, vector<1x1x8x128xf32>,
    return
  }
  func.func @transform_0(%arg0: i32) -> (i32, i32) {
    %c0_i32 = arith.constant 0 : i32
    %c0_i32_0 = arith.constant 0 : i32
    return %arg0, %c0_i32 : i32, i32
  }
  func.func @transform_1(%arg0: i32) -> (i32, i32) {
    %c0_i32 = arith.constant 0 : i32
    %c0_i32_0 = arith.constant 0 : i32
    return %arg0, %c0_i32 : i32, i32
  }
  func.func @transform_2(%arg0: i32) -> (i32, i32, i32, i32) {
    %c0_i32 = arith.constant 0 : i32
    %c0_i32_0 = arith.constant 0 : i32
    %c0_i32_1 = arith.constant 0 : i32
    %c0_i32_2 = arith.constant 0 : i32
    return %arg0, %c0_i32, %c0_i32_0, %c0_i32_1 : i32, i32, i32, i32
  }
}

</mosaic_0001>

<bundles_post_ra>
// kernel: neg_loss.1
= control target key start
LH: loop header
LB: loop body
LE: loop exit
PB: predicated region body
PF: predicated region fallthrough
CT: control target
= control target key end

     0   :  { %v136_v11 = vmov 0.0   ;;  %s195_s0 = inlined_call_operand.vmem [shape: f32[16,128], index: 0, kind: input, shape index: {}]   ;;  %s196_s1 = inlined_call_operand.vmem [shape: f32[16,128], index: 1, kind: input, shape index: {}]   ;;  %s197_s2 = inlined_call_operand.vmem [shape: f32[1,3,8,128], index: 2, kind: output, shape index: {}]  }
   0x1   :  { %v11_v0 = vld [vmem:[%s195_s0] sm:$0xff]  ;;  %v12_v1 = vld [vmem:[%s195_s0 + $0x8] sm:$0xff] }
   0x2   :  { %v111_v2 = vmul.f32 -1.442695, %v11_v0  ;;  %v112_v3 = vmul.f32 -1.442695, %v12_v1  ;;  %v161_v8 = vld [vmem:[%s196_s1] sm:$0xff]  ;;  %v166_v9 = vld [vmem:[%s196_s1 + $0x8] sm:$0xff] }
   0x3   :  { %vm57_vm0 = vcmp.eq.f32.partialorder %v161_v8, 1.0  ;;  %vm58_vm1 = vcmp.eq.f32.partialorder %v166_v9, 1.0  ;;  %v69_v40 = vsub.f32 1.0, %v161_v8  ;;  %v70_v41 = vsub.f32 1.0, %v166_v9 }
   0x4   :  { %120 = vpow2.f32 %v111_v2  ;;  %v171_v12 = vsel %vm57_vm0, 1.0, %v136_v11  ;;  %v174_v13 = vsel %vm58_vm1, 1.0, %v136_v11  ;;  %vm63_vm10 = vcmp.lt.f32.partialorder %v161_v8, 1.0 }
   0x5   :  { %122 = vpow2.f32 %v112_v3  ;;  %v104_v16 = vadd.f32 %v174_v13, %v171_v12  ;;  %v71_v43 = vmul.f32 %v69_v40, %v69_v40  ;;  %v72_v46 = vmul.f32 %v70_v41, %v70_v41 }
   0x6   :  { %vm64_vm11 = vcmp.lt.f32.partialorder %v166_v9, 1.0  ;;  %v115_v63 = vsel %vm63_vm10, 1.0, %v136_v11 }
   0x7   :  { %118 = vst [vmem:[%s197_s2 + $0x10] sm:$0xff] %v104_v16  ;;  %v73_v55 = vmul.f32 %v71_v43, %v71_v43  ;;  %v74_v58 = vmul.f32 %v72_v46, %v72_v46  ;;  %v116_v1 = vsel %vm64_vm11, 1.0, %v136_v11 }
   0xa   :  { %v121_v4 = vpop.eup %120 }
   0xb   :  { %v123_v5 = vpop.eup %122  ;;  %v21_v6 = vadd.f32 1.0, %v121_v4 }
   0xc   :  { %v22_v7 = vadd.f32 1.0, %v123_v5 }
   0xd   :  { %124 = vrcp.f32 %v21_v6  ;;  %vm28_vm2 = vweird.f32 %v21_v6  ;;  %v34_v17 = vand.u32 2147483648, %v21_v6  ;;  %v32_v20 = vand.u32 2147483647, %v21_v6 }
   0xe   :  { %126 = vrcp.f32 %v22_v7  ;;  %v49_v21 = vand.u32 2147483648, %v22_v7  ;;  %vm43_vm4 = vweird.f32 %v22_v7  ;;  %v47_v23 = vand.u32 2147483647, %v22_v7 }
   0xf   :  { %v35_v25 = vor.u32 1.1754944e-38, %v34_v17  ;;  %vm33_vm7 = vcmp.eq.f32.partialorder %v32_v20, 8.507059e+37 }
  0x10   :  { %v50_v28 = vor.u32 1.1754944e-38, %v49_v21  ;;  %vm48_vm9 = vcmp.eq.f32.partialorder %v47_v23, 8.507059e+37 }
  0x13   :  { %v125_v10 = vpop.eup %124 }
  0x14   :  { %v127_v14 = vpop.eup %126  ;;  %v24_v15 = vmul.f32 %v125_v10, %v21_v6  ;;  %vm29_vm3 = vweird.f32 %v125_v10 }
  0x15   :  { %v39_v18 = vmul.f32 %v127_v14, %v22_v7  ;;  %vm44_vm5 = vweird.f32 %v127_v14  ;;  %vm30_vm6 = vmor %vm28_vm2, %vm29_vm3 }
  0x16   :  { %v25_v19 = vsub.f32 1.0, %v24_v15  ;;  %vm45_vm8 = vmor %vm43_vm4, %vm44_vm5 }
  0x17   :  { %v40_v22 = vsub.f32 1.0, %v39_v18 }
  0x18   :  { %v26_v24 = vmul.f32 %v125_v10, %v25_v19 }
  0x19   :  { %v41_v26 = vmul.f32 %v127_v14, %v40_v22 }
  0x1a   :  { %v27_v27 = vadd.f32 %v125_v10, %v26_v24 }
  0x1b   :  { %v42_v29 = vadd.f32 %v127_v14, %v41_v26 }
  0x1c   :  { %v31_v30 = vsel %vm30_vm6, %v125_v10, %v27_v27 }
  0x1d   :  { %v36_v31 = vsel %vm33_vm7, %v35_v25, %v31_v30  ;;  %v46_v32 = vsel %vm45_vm8, %v127_v14, %v42_v29 }
  0x1e   :  { %v51_v33 = vsel %vm48_vm9, %v50_v28, %v46_v32  ;;  %v53_v34 = vmax.f32 %v36_v31, 0.0001 }
  0x1f   :  { %v54_v35 = vmax.f32 %v51_v33, 0.0001 }
  0x20   :  { %v55_v36 = vmin.f32 %v53_v34, 0.9999 }
  0x21   :  { %v56_v37 = vmin.f32 %v54_v35, 0.9999 }
  0x22   :  { %v75_v38 = vsub.f32 1.0, %v55_v36  ;;  %128 = vlog2.f32 %v55_v36  ;;  %v91_v49 = vmul.f32 %v55_v36, %v55_v36 }
  0x23   :  { %v76_v39 = vsub.f32 1.0, %v56_v37  ;;  %130 = vlog2.f32 %v56_v37  ;;  %v92_v52 = vmul.f32 %v56_v37, %v56_v37 }
  0x24   :  { %132 = vlog2.f32 %v75_v38  ;;  %v81_v42 = vmul.f32 %v75_v38, %v75_v38 }
  0x25   :  { %134 = vlog2.f32 %v76_v39  ;;  %v82_v45 = vmul.f32 %v76_v39, %v76_v39 }
  0x28   :  { %v129_v44 = vpop.eup %128 }
  0x29   :  { %v131_v47 = vpop.eup %130  ;;  %v78_v48 = vmul.f32 0.6931472, %v129_v44 }
  0x2a   :  { %v133_v50 = vpop.eup %132  ;;  %v80_v51 = vmul.f32 0.6931472, %v131_v47 }
  0x2b   :  { %v135_v53 = vpop.eup %134  ;;  %v83_v54 = vmul.f32 %v81_v42, %v78_v48  ;;  %v88_v56 = vmul.f32 0.6931472, %v133_v50 }
  0x2c   :  { %v84_v57 = vmul.f32 %v82_v45, %v80_v51  ;;  %v90_v59 = vmul.f32 0.6931472, %v135_v53 }
  0x2d   :  { %v85_v60 = vmul.f32 %v171_v12, %v83_v54  ;;  %v93_v61 = vmul.f32 %v91_v49, %v88_v56 }
  0x2e   :  { %v86_v62 = vmul.f32 %v174_v13, %v84_v57  ;;  %v94_v0 = vmul.f32 %v92_v52, %v90_v59 }
  0x2f   :  { %v95_v2 = vmul.f32 %v93_v61, %v73_v55 }
  0x30   :  { %v99_v3 = vadd.f32 %v86_v62, %v85_v60  ;;  %v96_v4 = vmul.f32 %v94_v0, %v74_v58 }
  0x31   :  { %v97_v5 = vmul.f32 %v115_v63, %v95_v2 }
  0x32   :  { %100 = vst [vmem:[%s197_s2] sm:$0xff] %v99_v3  ;;  %v98_v6 = vmul.f32 %v116_v1, %v96_v4 }
  0x34   :  { %v101_v7 = vadd.f32 %v98_v6, %v97_v5 }
  0x36   :  { %117 = vst [vmem:[%s197_s2 + $0x8] sm:$0xff] %v101_v7 }

</bundles_post_ra>
